<compile_context>
chip_gen: v7x
topology: tpu7x:2x2x1
jax: 0.10.0
libtpu: 0.0.40
codegen_flags: <defaults>
</compile_context>

<pallas_src>
import jax
import jax.numpy as jnp
from jax.experimental import pallas as pl
from jax.experimental.pallas import tpu as pltpu


def _round_up(n, m):
    return ((n + m - 1) // m) * m


# ----------------------------------------------------------------------------
# Kernel: whole 4-layer MLP fused, one batch tile per grid step.
# ----------------------------------------------------------------------------
def sae_kernel(x_ref,
               w1_ref, b1_ref,
               w2_ref, b2_ref,
               w3_ref, b3_ref,
               w4_ref, b4_ref,
               o_ref):
    cdt = w1_ref.dtype                      # MXU operand dtype (bf16 typically)

    def sigmoid(z):
        # f32 in / f32 out; one EUP transcendental, no VALU divide.
        return 0.5 * jnp.tanh(0.5 * z) + 0.5

    # x arrives in its storage dtype (f32); cast to the MXU operand dtype
    # in-kernel (VPU has huge slack here) instead of a wrapper-side XLA pass.
    x = x_ref[...].astype(cdt)
    h = sigmoid(jnp.dot(x, w1_ref[...],
                        preferred_element_type=jnp.float32) + b1_ref[...])
    h = sigmoid(jnp.dot(h.astype(cdt), w2_ref[...],
                        preferred_element_type=jnp.float32) + b2_ref[...])
    h = sigmoid(jnp.dot(h.astype(cdt), w3_ref[...],
                        preferred_element_type=jnp.float32) + b3_ref[...])
    out = jnp.dot(h.astype(cdt), w4_ref[...],
                  preferred_element_type=jnp.float32) + b4_ref[...]
    o_ref[...] = out.astype(o_ref.dtype)


# ----------------------------------------------------------------------------
# Wrapper
# ----------------------------------------------------------------------------
def _vmem_capacity_bytes():
    """Generation-aware VMEM capacity (v5e/v6e: 128 MiB, v7x: 64 MiB/TC)."""
    try:
        return int(pltpu.get_tpu_info().vmem_capacity_bytes)
    except Exception:
        return 64 << 20   # conservative fallback (v7x per-core)


def _make_spec(block_shape, index_map, buffers=None):
    """BlockSpec with optional N-deep pipelining; falls back if pipeline_mode
    is not available on this jax version."""
    if buffers is None:
        return pl.BlockSpec(block_shape, index_map)
    try:
        return pl.BlockSpec(block_shape, index_map,
                            pipeline_mode=pl.Buffered(buffers))
    except TypeError:
        return pl.BlockSpec(block_shape, index_map)


def sae_forward(x, params, *, tile_batch=None, compute_dtype=jnp.bfloat16,
                out_dtype=jnp.float32, return_padded=False,
                stream_buffers=3, max_tile_batch=2048):
    """Fused SAE forward.

    x: (B, movies_max), any float dtype (streamed as-is, no wrapper cast).
    params: dict of W (in,out) / b (1,out) arrays.
    tile_batch: optional cap on rows per grid step; by default derived from a
        generation-aware VMEM budget.
    out_dtype: jnp.float32 (PyTorch parity) or jnp.bfloat16 (halves writeback).
    return_padded: return the (Bp, Mp) buffer and let the consumer slice
        lazily (avoids an extra HBM pass on this HBM-bound op).
    """
    B, M = x.shape
    Mp = _round_up(M, 128)                        # lane-dense feature width

    csize = jnp.dtype(compute_dtype).itemsize
    osize = jnp.dtype(out_dtype).itemsize
    xsize = jnp.dtype(x.dtype).itemsize
    row_mult = 16                                 # sublane packing (bf16-safe)
    n_stream = 2 if stream_buffers is None else int(stream_buffers)

    # ---- VMEM budget -> tile_batch -----------------------------------------
    capacity = _vmem_capacity_bytes()
    budget = (capacity * 3) // 4                  # ~25% headroom

    # Resident weights/biases (constant index maps, default 2-deep buffers).
    fixed = (2 * (Mp * 20 + 20 * Mp) * csize      # w1 + w4
             + 2 * Mp * 4                         # b4 (f32)
             + 2 * (20 * 10 + 10 * 20) * csize    # w2 + w3
             + 2 * (20 + 10 + 20) * 4             # b1..b3 (f32)
             + (2 << 20))                         # compiler scratch / misc

    # Per batch-row VMEM cost of one grid step.
    per_row = Mp * (n_stream * xsize              # streamed x buffers (f32)
                    + n_stream * osize            # streamed out buffers
                    + 4                           # f32 fc4 intermediate tile
                    + csize)                      # in-kernel bf16 copy of x
    per_row += 8 * (20 + 10 + 20)                 # hidden activations (slack)

    avail = max(0, budget - fixed)
    tb_budget = max(row_mult, (avail // per_row) // row_mult * row_mult)
    tb = min(tb_budget, int(max_tile_batch), _round_up(B, row_mult))
    if tile_batch is not None:
        tb = min(tb, max(row_mult, (int(tile_batch) // row_mult) * row_mult))
    tb = max(row_mult, tb)

    Bp = _round_up(B, tb)
    grid = (Bp // tb,)

    vmem_limit = int(min(max(fixed + tb * per_row + (2 << 20), 32 << 20),
                         budget))

    # ---- Operand prep (no pad/cast pass for x when already aligned) --------
    if (Mp != M) or (Bp != B):
        xp = jnp.zeros((Bp, Mp), x.dtype).at[:B, :M].set(x)
    else:
        xp = x                                    # zero extra HBM traffic

    if Mp != M:
        w1 = jnp.zeros((Mp, 20), compute_dtype).at[:M, :].set(
            params["w1"].astype(compute_dtype))
        w4 = jnp.zeros((20, Mp), compute_dtype).at[:, :M].set(
            params["w4"].astype(compute_dtype))
        b4 = jnp.zeros((1, Mp), jnp.float32).at[:, :M].set(
            params["b4"].astype(jnp.float32))
    else:
        w1 = params["w1"].astype(compute_dtype)
        w4 = params["w4"].astype(compute_dtype)
        b4 = params["b4"].astype(jnp.float32)
    w2 = params["w2"].astype(compute_dtype)
    w3 = params["w3"].astype(compute_dtype)
    b1 = params["b1"].astype(jnp.float32)
    b2 = params["b2"].astype(jnp.float32)
    b3 = params["b3"].astype(jnp.float32)

    def resident_spec(arr):
        nd = arr.ndim
        return pl.BlockSpec(arr.shape, lambda i, _nd=nd: (0,) * _nd)

    def build_and_call(buf_count):
        x_spec = _make_spec((tb, Mp), lambda i: (i, 0), buf_count)
        o_spec = _make_spec((tb, Mp), lambda i: (i, 0), buf_count)
        return pl.pallas_call(
            sae_kernel,
            out_shape=jax.ShapeDtypeStruct((Bp, Mp), out_dtype),
            grid_spec=pltpu.PrefetchScalarGridSpec(
                num_scalar_prefetch=0,
                grid=grid,
                in_specs=[x_spec,
                          resident_spec(w1), resident_spec(b1),
                          resident_spec(w2), resident_spec(b2),
                          resident_spec(w3), resident_spec(b3),
                          resident_spec(w4), resident_spec(b4)],
                out_specs=o_spec,
            ),
            compiler_params=pltpu.CompilerParams(
                dimension_semantics=("parallel",),
                vmem_limit_bytes=vmem_limit),
        )(xp, w1, b1, w2, b2, w3, b3, w4, b4)

    if stream_buffers is None or int(stream_buffers) == 2:
        out_padded = build_and_call(None)
    else:
        try:
            out_padded = build_and_call(int(stream_buffers))
        except Exception:
            # pipeline_mode / Buffered(N) unsupported here -> default 2-deep.
            out_padded = build_and_call(None)

    if return_padded:
        return out_padded
    if (Bp != B) or (Mp != M):
        return out_padded[:B, :M]
    return out_padded


# ----------------------------------------------------------------------------
# Params / references
# ----------------------------------------------------------------------------
def init_params(key, movies_max):
    """PyTorch nn.Linear-style init: U(-1/sqrt(fan_in), 1/sqrt(fan_in)).
    Weights stored as (in, out)."""
    dims = [(movies_max, 20), (20, 10), (10, 20), (20, movies_max)]
    params = {}
    for idx, (fan_in, fan_out) in enumerate(dims, start=1):
        key, kw, kb = jax.random.split(key, 3)
        bound = 1.0 / jnp.sqrt(jnp.float32(fan_in))
        params[f"w{idx}"] = jax.random.uniform(
            kw, (fan_in, fan_out), jnp.float32, -bound, bound)
        params[f"b{idx}"] = jax.random.uniform(
            kb, (1, fan_out), jnp.float32, -bound, bound)
    return params


def sae_reference_mixed(x, params, compute_dtype=jnp.bfloat16):
    """Pure-JAX reference following the same bf16-operand / f32-accumulation
    path as the kernel (tanh-form sigmoid is exact)."""
    def sigmoid(z):
        return 0.5 * jnp.tanh(0.5 * z) + 0.5

    def c(a):
        return a.astype(compute_dtype)

    h = sigmoid(jnp.dot(c(x), c(params["w1"]),
                        preferred_element_type=jnp.float32) + params["b1"])
    h = sigmoid(jnp.dot(c(h), c(params["w2"]),
                        preferred_element_type=jnp.float32) + params["b2"])
    h = sigmoid(jnp.dot(c(h), c(params["w3"]),
                        preferred_element_type=jnp.float32) + params["b3"])
    return jnp.dot(c(h), c(params["w4"]),
                   preferred_element_type=jnp.float32) + params["b4"]


def sae_reference_f32(x, params):
    """Full-precision reference matching the original PyTorch module."""
    h = jax.nn.sigmoid(x @ params["w1"] + params["b1"])
    h = jax.nn.sigmoid(h @ params["w2"] + params["b2"])
    h = jax.nn.sigmoid(h @ params["w3"] + params["b3"])
    return h @ params["w4"] + params["b4"]


# ----------------------------------------------------------------------------
# Demo / correctness check
# ----------------------------------------------------------------------------
if __name__ == "__main__":
    MOVIES_MAX = 200   # not a multiple of 128 -> exercises feature padding
    BATCH = 64

    key = jax.random.PRNGKey(0)
    key, kx = jax.random.split(key)
    params = init_params(key, MOVIES_MAX)
    # Ratings-like input: sparse non-negative values (0 = unrated).
    x = jax.random.uniform(kx, (BATCH, MOVIES_MAX), jnp.float32, 0.0, 5.0)
    x = jnp.where(x < 2.5, 0.0, x)

    ref_mixed = sae_reference_mixed(x, params)
    ref_f32 = sae_reference_f32(x, params)

    # 1) Default path: VMEM-budget-derived tile, f32 output (PyTorch parity).
    out = jax.block_until_ready(sae_forward(x, params))
    assert out.shape == (BATCH, MOVIES_MAX)
    assert jnp.allclose(out, ref_mixed, atol=2e-3, rtol=2e-3), \
        "mismatch vs mixed-precision reference"
    assert jnp.allclose(out, ref_f32, atol=5e-2, rtol=5e-2), \
        "mismatch vs f32 reference"

    # 2) Multi-step grid (exercises streamed pipelining) + bf16 output option.
    out_bf16 = jax.block_until_ready(
        sae_forward(x, params, tile_batch=32, out_dtype=jnp.bfloat16))
    assert out_bf16.shape == (BATCH, MOVIES_MAX)
    assert jnp.allclose(out_bf16.astype(jnp.float32), ref_mixed,
                        atol=2e-2, rtol=2e-2), \
        "mismatch vs mixed-precision reference (bf16 output)"

    print("KERNEL_OK")
</pallas_src>

<mosaic_0001>
module attributes {stable_mosaic.version = 11 : i64} {
  func.func @sae_kernel(%arg0: i32, %arg1: memref<64x256xf32, #tpu.memory_space<vmem>>, %arg2: memref<256x20xbf16, #tpu.memory_space<vmem>>, %arg3: memref<1x20xf32, #tpu.memory_space<vmem>>, %arg4: memref<20x10xbf16, #tpu.memory_space<vmem>>, %arg5: memref<1x10xf32, #tpu.memory_space<vmem>>, %arg6: memref<10x20xbf16, #tpu.memory_space<vmem>>, %arg7: memref<1x20xf32, #tpu.memory_space<vmem>>, %arg8: memref<20x256xbf16, #tpu.memory_space<vmem>>, %arg9: memref<1x256xf32, #tpu.memory_space<vmem>>, %arg10: memref<64x256xf32, #tpu.memory_space<vmem>>) attributes {dimension_semantics = [#tpu.dimension_semantics<parallel>], iteration_bounds = array<i64: 1>, scalar_prefetch = 0 : i64, scratch_operands = 0 : i64, tpu.core_type = #tpu.core_type<tc>, window_params = [{transform_indices = @transform_0, window_bounds = array<i64: 64, 256>}, {pipeline_mode = #tpu.pipeline_mode<synchronous>, transform_indices = @transform_1, window_bounds = array<i64: 256, 20>}, {pipeline_mode = #tpu.pipeline_mode<synchronous>, transform_indices = @transform_2, window_bounds = array<i64: 1, 20>}, {pipeline_mode = #tpu.pipeline_mode<synchronous>, transform_indices = @transform_3, window_bounds = array<i64: 20, 10>}, {pipeline_mode = #tpu.pipeline_mode<synchronous>, transform_indices = @transform_4, window_bounds = array<i64: 1, 10>}, {pipeline_mode = #tpu.pipeline_mode<synchronous>, transform_indices = @transform_5, window_bounds = array<i64: 10, 20>}, {pipeline_mode = #tpu.pipeline_mode<synchronous>, transform_indices = @transform_6, window_bounds = array<i64: 1, 20>}, {pipeline_mode = #tpu.pipeline_mode<synchronous>, transform_indices = @transform_7, window_bounds = array<i64: 20, 256>}, {pipeline_mode = #tpu.pipeline_mode<synchronous>, transform_indices = @transform_8, window_bounds = array<i64: 1, 256>}, {transform_indices = @transform_9, window_bounds = array<i64: 64, 256>}]} {
    %c0 = arith.constant 0 : index
    %c0_0 = arith.constant 0 : index
    %0 = vector.load %arg1[%c0, %c0_0] : memref<64x256xf32, #tpu.memory_space<vmem>>, vector<64x256xf32>
    %1 = arith.truncf %0 : vector<64x256xf32> to vector<64x256xbf16>
    %c0_1 = arith.constant 0 : index
    %c0_2 = arith.constant 0 : index
    %2 = vector.load %arg2[%c0_1, %c0_2] : memref<256x20xbf16, #tpu.memory_space<vmem>>, vector<256x20xbf16>
    %cst = arith.constant dense<0.000000e+00> : vector<64x20xf32>
    %3 = tpu.matmul %1, %2, %cst {dimension_numbers = #tpu.dot_dimension_numbers<[1], [0], [0], [1], [0, 0, 1, 1], [], []>} : vector<64x256xbf16>, vector<256x20xbf16>, vector<64x20xf32> -> vector<64x20xf32>
    %c0_3 = arith.constant 0 : index
    %c0_4 = arith.constant 0 : index
    %4 = vector.load %arg3[%c0_3, %c0_4] : memref<1x20xf32, #tpu.memory_space<vmem>>, vector<1x20xf32>
    %5 = vector.broadcast %4 : vector<1x20xf32> to vector<64x20xf32>
    %6 = arith.addf %3, %5 : vector<64x20xf32>
    %cst_5 = arith.constant 5.000000e-01 : f32
    %7 = vector.broadcast %cst_5 : f32 to vector<64x20xf32>
    %8 = arith.mulf %7, %6 : vector<64x20xf32>
    %9 = math.tanh %8 : vector<64x20xf32>
    %cst_6 = arith.constant 5.000000e-01 : f32
    %10 = vector.broadcast %cst_6 : f32 to vector<64x20xf32>
    %11 = arith.mulf %10, %9 : vector<64x20xf32>
    %cst_7 = arith.constant 5.000000e-01 : f32
    %12 = vector.broadcast %cst_7 : f32 to vector<64x20xf32>
    %13 = arith.addf %11, %12 : vector<64x20xf32>
    %14 = arith.truncf %13 : vector<64x20xf32> to vector<64x20xbf16>
    %c0_8 = arith.constant 0 : index
    %c0_9 = arith.constant 0 : index
    %15 = vector.load %arg4[%c0_8, %c0_9] : memref<20x10xbf16, #tpu.memory_space<vmem>>, vector<20x10xbf16>
    %cst_10 = arith.constant dense<0.000000e+00> : vector<64x10xf32>
    %16 = tpu.matmul %14, %15, %cst_10 {dimension_numbers = #tpu.dot_dimension_numbers<[1], [0], [0], [1], [0, 0, 1, 1], [], []>} : vector<64x20xbf16>, vector<20x10xbf16>, vector<64x10xf32> -> vector<64x10xf32>
    %c0_11 = arith.constant 0 : index
    %c0_12 = arith.constant 0 : index
    %17 = vector.load %arg5[%c0_11, %c0_12] : memref<1x10xf32, #tpu.memory_space<vmem>>, vector<1x10xf32>
    %18 = vector.broadcast %17 : vector<1x10xf32> to vector<64x10xf32>
    %19 = arith.addf %16, %18 : vector<64x10xf32>
    %cst_13 = arith.constant 5.000000e-01 : f32
    %20 = vector.broadcast %cst_13 : f32 to vector<64x10xf32>
    %21 = arith.mulf %20, %19 : vector<64x10xf32>
    %22 = math.tanh %21 : vector<64x10xf32>
    %cst_14 = arith.constant 5.000000e-01 : f32
    %23 = vector.broadcast %cst_14 : f32 to vector<64x10xf32>
    %24 = arith.mulf %23, %22 : vector<64x10xf32>
    %cst_15 = arith.constant 5.000000e-01 : f32
    %25 = vector.broadcast %cst_15 : f32 to vector<64x10xf32>
    %26 = arith.addf %24, %25 : vector<64x10xf32>
    %27 = arith.truncf %26 : vector<64x10xf32> to vector<64x10xbf16>
    %c0_16 = arith.constant 0 : index
    %c0_17 = arith.constant 0 : index
    %28 = vector.load %arg6[%c0_16, %c0_17] : memref<10x20xbf16, #tpu.memory_space<vmem>>, vector<10x20xbf16>
    %cst_18 = arith.constant dense<0.000000e+00> : vector<64x20xf32>
    %29 = tpu.matmul %27, %28, %cst_18 {dimension_numbers = #tpu.dot_dimension_numbers<[1], [0], [0], [1], [0, 0, 1, 1], [], []>} : vector<64x10xbf16>, vector<10x20xbf16>, vector<64x20xf32> -> vector<64x20xf32>
    %c0_19 = arith.constant 0 : index
    %c0_20 = arith.constant 0 : index
    %30 = vector.load %arg7[%c0_19, %c0_20] : memref<1x20xf32, #tpu.memory_space<vmem>>, vector<1x20xf32>
    %31 = vector.broadcast %30 : vector<1x20xf32> to vector<64x20xf32>
    %32 = arith.addf %29, %31 : vector<64x20xf32>
    %cst_21 = arith.constant 5.000000e-01 : f32
    %33 = vector.broadcast %cst_21 : f32 to vector<64x20xf32>
    %34 = arith.mulf %33, %32 : vector<64x20xf32>
    %35 = math.tanh %34 : vector<64x20xf32>
    %cst_22 = arith.constant 5.000000e-01 : f32
    %36 = vector.broadcast %cst_22 : f32 to vector<64x20xf32>
    %37 = arith.mulf %36, %35 : vector<64x20xf32>
    %cst_23 = arith.constant 5.000000e-01 : f32
    %38 = vector.broadcast %cst_23 : f32 to vector<64x20xf32>
    %39 = arith.addf %37, %38 : vector<64x20xf32>
    %40 = arith.truncf %39 : vector<64x20xf32> to vector<64x20xbf16>
    %c0_24 = arith.constant 0 : index
    %c0_25 = arith.constant 0 : index
    %41 = vector.load %arg8[%c0_24, %c0_25] : memref<20x256xbf16, #tpu.memory_space<vmem>>, vector<20x256xbf16>
    %cst_26 = arith.constant dense<0.000000e+00> : vector<64x256xf32>
    %42 = tpu.matmul %40, %41, %cst_26 {dimension_numbers = #tpu.dot_dimension_numbers<[1], [0], [0], [1], [0, 0, 1, 1], [], []>} : vector<64x20xbf16>, vector<20x256xbf16>, vector<64x256xf32> -> vector<64x256xf32>
    %c0_27 = arith.constant 0 : index
    %c0_28 = arith.constant 0 : index
    %43 = vector.load %arg9[%c0_27, %c0_28] : memref<1x256xf32, #tpu.memory_space<vmem>>, vector<1x256xf32>
    %44 = vector.broadcast %43 : vector<1x256xf32> to vector<64x256xf32>
    %45 = arith.addf %42, %44 : vector<64x256xf32>
    %c0_29 = arith.constant 0 : index
    %c0_30 = arith.constant 0 : index
    %46 = vector.load %arg10[%c0_29, %c0_30] : memref<64x256xf32, #tpu.memory_space<vmem>>, vector<64x256xf32>
    tpu.vector_store %arg10[%c0_29, %c0_30], %45 {strides = array<i32>} : memref<64x256xf32, #tpu.memory_space<vmem>>, vector<64x256xf32>,
    return
  }
  func.func @transform_0(%arg0: i32) -> (i32, i32) {
    %c0_i32 = arith.constant 0 : i32
    %c0_i32_0 = arith.constant 0 : i32
    return %arg0, %c0_i32 : i32, i32
  }
  func.func @transform_1(%arg0: i32) -> (i32, i32) {
    %c0_i32 = arith.constant 0 : i32
    %c0_i32_0 = arith.constant 0 : i32
    %c0_i32_1 = arith.constant 0 : i32
    return %c0_i32, %c0_i32_0 : i32, i32
  }
  func.func @transform_2(%arg0: i32) -> (i32, i32) {
    %c0_i32 = arith.constant 0 : i32
    %c0_i32_0 = arith.constant 0 : i32
    %c0_i32_1 = arith.constant 0 : i32
    return %c0_i32, %c0_i32_0 : i32, i32
  }
  func.func @transform_3(%arg0: i32) -> (i32, i32) {
    %c0_i32 = arith.constant 0 : i32
    %c0_i32_0 = arith.constant 0 : i32
    %c0_i32_1 = arith.constant 0 : i32
    return %c0_i32, %c0_i32_0 : i32, i32
  }
  func.func @transform_4(%arg0: i32) -> (i32, i32) {
    %c0_i32 = arith.constant 0 : i32
    %c0_i32_0 = arith.constant 0 : i32
    %c0_i32_1 = arith.constant 0 : i32
    return %c0_i32, %c0_i32_0 : i32, i32
  }
  func.func @transform_5(%arg0: i32) -> (i32, i32) {
    %c0_i32 = arith.constant 0 : i32
    %c0_i32_0 = arith.constant 0 : i32
    %c0_i32_1 = arith.constant 0 : i32
    return %c0_i32, %c0_i32_0 : i32, i32
  }
  func.func @transform_6(%arg0: i32) -> (i32, i32) {
    %c0_i32 = arith.constant 0 : i32
    %c0_i32_0 = arith.constant 0 : i32
    %c0_i32_1 = arith.constant 0 : i32
    return %c0_i32, %c0_i32_0 : i32, i32
  }
  func.func @transform_7(%arg0: i32) -> (i32, i32) {
    %c0_i32 = arith.constant 0 : i32
    %c0_i32_0 = arith.constant 0 : i32
    %c0_i32_1 = arith.constant 0 : i32
    return %c0_i32, %c0_i32_0 : i32, i32
  }
  func.func @transform_8(%arg0: i32) -> (i32, i32) {
    %c0_i32 = arith.constant 0 : i32
    %c0_i32_0 = arith.constant 0 : i32
    %c0_i32_1 = arith.constant 0 : i32
    return %c0_i32, %c0_i32_0 : i32, i32
  }
  func.func @transform_9(%arg0: i32) -> (i32, i32) {
    %c0_i32 = arith.constant 0 : i32
    %c0_i32_0 = arith.constant 0 : i32
    return %arg0, %c0_i32 : i32, i32
  }
}

</mosaic_0001>

<bundles_post_ra>
// kernel: tpu_custom_call.1
= control target key start
LH: loop header
LB: loop body
LE: loop exit
PB: predicated region body
PF: predicated region fallthrough
CT: control target
= control target key end

     0   :  { %s1142_s0 = inlined_call_operand.vmem [shape: f32[64,256], index: 0, kind: input, shape index: {}]   ;;  %s1143_s1 = inlined_call_operand.vmem [shape: bf16[256,20], index: 1, kind: input, shape index: {}]   ;;  %s1144_s2 = inlined_call_operand.vmem [shape: f32[1,20], index: 2, kind: input, shape index: {}]   ;;  %s1145_s3 = inlined_call_operand.vmem [shape: bf16[20,10], index: 3, kind: input, shape index: {}]   ;;  %s1146_s4 = inlined_call_operand.vmem [shape: f32[1,10], index: 4, kind: input, shape index: {}]   ;;  %s1147_s5 = inlined_call_operand.vmem [shape: bf16[10,20], index: 5, kind: input, shape index: {}]   ;;  %s1148_s6 = inlined_call_operand.vmem [shape: f32[1,20], index: 6, kind: input, shape index: {}]   ;;  %s1149_s7 = inlined_call_operand.vmem [shape: bf16[20,256], index: 7, kind: input, shape index: {}]   ;;  %s1150_s8 = inlined_call_operand.vmem [shape: f32[1,256], index: 8, kind: input, shape index: {}]   ;;  %s1151_s9 = inlined_call_operand.hbm [shape: f32[64,256], index: 9, kind: output, shape index: {}]  }
   0x1   :  { %v834_v0 = vld [vmem:[%s1143_s1 + $0x40] sm:$0xff]   ;;  %v836_v2 = vld [vmem:[%s1143_s1 + $0x48] sm:$0xff]   ;;  %v838_v4 = vld [vmem:[%s1143_s1 + $0x50] sm:$0xff]  }
   0x2   :  { %v835_v1 = vld [vmem:[%s1143_s1] sm:$0xff]   ;;  %755 = vmatprep.subr.bf16.mxu0 %v834_v0  ;;  %v837_v3 = vld [vmem:[%s1143_s1 + $0x8] sm:$0xff]   ;;  %v839_v5 = vld [vmem:[%s1143_s1 + $0x10] sm:$0xff]  }
   0x3   :  { %756 = vmatpush3.bf16.msra.mxu0 %v835_v1  ;;  %v840_v6 = vld [vmem:[%s1143_s1 + $0x58] sm:$0xff]   ;;  %v842_v8 = vld [vmem:[%s1143_s1 + $0x60] sm:$0xff]   ;;  %v844_v10 = vld [vmem:[%s1143_s1 + $0x68] sm:$0xff]  }
   0x4   :  { %757 = vmatprep.subr.bf16.mxu0 %v836_v2  ;;  %v841_v7 = vld [vmem:[%s1143_s1 + $0x18] sm:$0xff]   ;;  %v843_v9 = vld [vmem:[%s1143_s1 + $0x20] sm:$0xff]   ;;  %v35_v11 = vld [vmem:[%s1142_s0 + $0x8] sm:$0xff] }
   0x5   :  { %v37_v12 = vld [vmem:[%s1142_s0 + $0x18] sm:$0xff]  ;;  %v845_v14 = vld [vmem:[%s1143_s1 + $0x28] sm:$0xff]   ;;  %v846_v15 = vld [vmem:[%s1143_s1 + $0x70] sm:$0xff]  }
   0x6   :  { %v51_v13 = vpack.c.bf16 %v37_v12, %v35_v11  ;;  %v847_v16 = vld [vmem:[%s1143_s1 + $0x30] sm:$0xff]  }
   0x7   :  { %758 = vmatpush3.bf16.msra.mxu0 %v837_v3 }
   0x8   :  { %759 = vmatprep.subr.bf16.mxu0 %v838_v4  ;;  %225 = vmatprep.mubr.bf16.mxu0 %v51_v13 }
   0xb   :  { %760 = vmatpush3.bf16.msra.mxu0 %v839_v5 }
   0xc   :  { %761 = vmatprep.subr.bf16.mxu0 %v840_v6 }
   0xf   :  { %762 = vmatpush3.bf16.msra.mxu0 %v841_v7 }
  0x10   :  { %763 = vmatprep.subr.bf16.mxu0 %v842_v8 }
  0x13   :  { %764 = vmatpush3.bf16.msra.mxu0 %v843_v9 }
  0x14   :  { %765 = vmatprep.subr.bf16.mxu0 %v844_v10 }
  0x17   :  { %766 = vmatpush3.bf16.msra.mxu0 %v845_v14 }
  0x18   :  { %14 = vsyncpa [#allocation3], 0  ;;  %767 = vmatprep.subr.bf16.mxu0 %v846_v15  ;;  %v848_v17 = vld [vmem:[%s1143_s1 + $0x78] sm:$0xff]   ;;  %v34_v19 = vld [vmem:[%s1142_s0] sm:$0xff]  ;;  %vm326_vm0 = vcmask 1041408   ;;  %vm313_vm1 = vcmask 162816  }
  0x19   :  { %v849_v18 = vld [vmem:[%s1143_s1 + $0x38] sm:$0xff]   ;;  %v36_v20 = vld [vmem:[%s1142_s0 + $0x10] sm:$0xff]  ;;  %v39_v21 = vld [vmem:[%s1142_s0 + $0x28] sm:$0xff]  ;;  %vm458_vm2 = vcmask 1044480   ;;  %vm445_vm3 = vcmask 80896  }
  0x1a   :  { %v41_v22 = vld [vmem:[%s1142_s0 + $0x38] sm:$0xff]  ;;  %v50_v23 = vpack.c.bf16 %v36_v20, %v34_v19  ;;  %v38_v25 = vld [vmem:[%s1142_s0 + $0x20] sm:$0xff]  ;;  %v40_v26 = vld [vmem:[%s1142_s0 + $0x30] sm:$0xff] }
  0x1b   :  { %768 = vmatpush3.bf16.msra.mxu0 %v847_v16  ;;  %v53_v24 = vpack.c.bf16 %v41_v22, %v39_v21  ;;  %v43_v27 = vld [vmem:[%s1142_s0 + $0x48] sm:$0xff]  ;;  %v45_v28 = vld [vmem:[%s1142_s0 + $0x58] sm:$0xff]  ;;  %v52_v29 = vpack.c.bf16 %v40_v26, %v38_v25  ;;  %v42_v31 = vld [vmem:[%s1142_s0 + $0x40] sm:$0xff] }
  0x1c   :  { %769 = vmatprep.subr.bf16.mxu0 %v848_v17  ;;  %v55_v30 = vpack.c.bf16 %v45_v28, %v43_v27  ;;  %v44_v32 = vld [vmem:[%s1142_s0 + $0x50] sm:$0xff]  ;;  %v47_v33 = vld [vmem:[%s1142_s0 + $0x68] sm:$0xff]  ;;  %v49_v34 = vld [vmem:[%s1142_s0 + $0x78] sm:$0xff] }
  0x1d   :  { %v54_v35 = vpack.c.bf16 %v44_v32, %v42_v31  ;;  %v57_v36 = vpack.c.bf16 %v49_v34, %v47_v33  ;;  %v46_v37 = vld [vmem:[%s1142_s0 + $0x60] sm:$0xff]  ;;  %v48_v38 = vld [vmem:[%s1142_s0 + $0x70] sm:$0xff]  ;;  %v851_v41 = vld [vmem:[%s1145_s3 + $0x8] ss:$0 sps:$4 sm:$0x33]  }
  0x1e   :  { %v56_v39 = vpack.c.bf16 %v48_v38, %v46_v37  ;;  %v850_v40 = vld [vmem:[%s1145_s3] sm:$0xff]   ;;  %v328_v42 = vsel %vm326_vm0, %v851_v41, 0 }
  0x1f   :  { %770 = vmatpush3.bf16.msra.mxu0 %v849_v18  ;;  %806 = vmatprep.subr.bf16.mxu1 %v850_v40  ;;  %v716_v44 = vld [vmem:[%s1144_s2] ss:$0 sm:$0xff] }
  0x20   :  { %807 = vmatpush3.bf16.msra.mxu1 %v850_v40 }
  0x21   :  { %828 = vmatprep.subr.msk.bf16.mxu1 %vm326_vm0, %v851_v41 }
  0x22   :  { %226 = vmatmul.mubr.bf16.vlgmr.msra.gmra.mrb[0].mxu0 %v50_v23 }
  0x23   :  { %233 = vmatprep.mubr.bf16.mxu0 %v53_v24 }
  0x24   :  { %809 = vmatpush3.bf16.msra.mxu1 %v328_v42 }
  0x2a   :  { %234 = vmatmul.mubr.bf16.gmra.mrb[4].mxu0 %v52_v29 }
  0x2b   :  { %241 = vmatprep.mubr.bf16.mxu0 %v55_v30 }
  0x32   :  { %242 = vmatmul.mubr.bf16.gmra.mrb[8].mxu0 %v54_v35 }
  0x33   :  { %249 = vmatprep.mubr.bf16.mxu0 %v57_v36 }
  0x3a   :  { %250 = vmatmul.mubr.bf16.gmra.mrb[12].mxu0 %v56_v39 }
  0xf5   :  { %v771_v43 = vpop.f32.mrb[0].mxu0 }
  0xf6   :  { %v772_v45 = vpop.f32.mrb[1].mxu0 }
  0xf7   :  { %v773_v46 = vadd.f32 %v772_v45, %v771_v43  ;;  %v774_v47 = vpop.f32.mrb[2].mxu0 }
  0xf8   :  { %v775_v48 = vpop.f32.mrb[3].mxu0 }
  0xf9   :  { %v228_v49 = vadd.f32 %v773_v46, %v716_v44  ;;  %v776_v50 = vadd.f32 %v775_v48, %v774_v47  ;;  %v852_v48 = vld [vmem:[%s1147_s5] sm:$0x1f]  }
  0xfa   :  { %829 = vmatprep.subr.msk.bf16.mxu1 %vm458_vm2, %v852_v48 }
  0xfb   :  { %v258_v51 = vmul.f32 0.5, %v228_v49  ;;  %v231_v52 = vadd.f32 %v776_v50, %v716_v44  ;;  %v460_v49 = vsel %vm458_vm2, %v852_v48, 0  ;;  %v733_v50 = vld [vmem:[%s1146_s4] ss:$0 sm:$0xff] }
  0xfd   :  { %858 = vtanh.f32 %v258_v51  ;;  %v259_v53 = vmul.f32 0.5, %v231_v52  ;;  %v777_v54 = vpop.f32.mrb[4].mxu0 }
  0xfe   :  { %v778_v55 = vpop.f32.mrb[5].mxu0 }
  0xff   :  { %860 = vtanh.f32 %v259_v53  ;;  %v779_v56 = vadd.f32 %v778_v55, %v777_v54  ;;  %v780_v57 = vpop.f32.mrb[6].mxu0 }
 0x100   :  { %v781_v58 = vpop.f32.mrb[7].mxu0 }
 0x101   :  { %v236_v59 = vadd.f32 %v779_v56, %v716_v44  ;;  %v782_v60 = vadd.f32 %v781_v58, %v780_v57 }
 0x103   :  { %v260_v61 = vmul.f32 0.5, %v236_v59  ;;  %v239_v62 = vadd.f32 %v782_v60, %v716_v44 }
 0x105   :  { %862 = vtanh.f32 %v260_v61  ;;  %v261_v63 = vmul.f32 0.5, %v239_v62  ;;  %v783_v0 = vpop.f32.mrb[8].mxu0 }
 0x106   :  { %v784_v1 = vpop.f32.mrb[9].mxu0 }
 0x107   :  { %v859_v2 = vpop.eup %858  ;;  %864 = vtanh.f32 %v261_v63  ;;  %v785_v3 = vadd.f32 %v784_v1, %v783_v0  ;;  %v786_v4 = vpop.f32.mrb[10].mxu0 }
 0x108   :  { %v787_v5 = vpop.f32.mrb[11].mxu0  ;;  %v274_v6 = vmul.f32 0.5, %v859_v2 }
 0x109   :  { %v861_v7 = vpop.eup %860  ;;  %v244_v8 = vadd.f32 %v785_v3, %v716_v44  ;;  %v788_v9 = vadd.f32 %v787_v5, %v786_v4 }
 0x10a   :  { %v275_v10 = vmul.f32 0.5, %v861_v7  ;;  %v282_v13 = vadd.f32 0.5, %v274_v6 }
 0x10b   :  { %v262_v11 = vmul.f32 0.5, %v244_v8  ;;  %v247_v12 = vadd.f32 %v788_v9, %v716_v44 }
 0x10c   :  { %v283_v14 = vadd.f32 0.5, %v275_v10 }
 0x10d   :  { %866 = vtanh.f32 %v262_v11  ;;  %v263_v15 = vmul.f32 0.5, %v247_v12  ;;  %v789_v16 = vpop.f32.mrb[12].mxu0 }
 0x10e   :  { %v790_v17 = vpop.f32.mrb[13].mxu0  ;;  %v290_v18 = vpack.c.bf16 %v283_v14, %v282_v13 }
 0x10f   :  { %v863_v19 = vpop.eup %862  ;;  %868 = vtanh.f32 %v263_v15  ;;  %v791_v20 = vadd.f32 %v790_v17, %v789_v16  ;;  %v792_v21 = vpop.f32.mrb[14].mxu0 }
 0x110   :  { %v276_v22 = vmul.f32 0.5, %v863_v19  ;;  %v793_v23 = vpop.f32.mrb[15].mxu0  ;;  %810 = vmatprep.mubr.msk.bf16.mxu1 %vm313_vm1, %v290_v18 }
 0x111   :  { %v865_v24 = vpop.eup %864  ;;  %v252_v25 = vadd.f32 %v791_v20, %v716_v44  ;;  %v794_v26 = vadd.f32 %v793_v23, %v792_v21 }
 0x112   :  { %v277_v27 = vmul.f32 0.5, %v865_v24  ;;  %v284_v30 = vadd.f32 0.5, %v276_v22 }
 0x113   :  { %v264_v28 = vmul.f32 0.5, %v252_v25  ;;  %v255_v29 = vadd.f32 %v794_v26, %v716_v44 }
 0x114   :  { %v285_v31 = vadd.f32 0.5, %v277_v27 }
 0x115   :  { %870 = vtanh.f32 %v264_v28  ;;  %v265_v32 = vmul.f32 0.5, %v255_v29 }
 0x116   :  { %v291_v33 = vpack.c.bf16 %v285_v31, %v284_v30 }
 0x117   :  { %v867_v34 = vpop.eup %866  ;;  %872 = vtanh.f32 %v265_v32 }
 0x118   :  { %v278_v35 = vmul.f32 0.5, %v867_v34  ;;  %811 = vmatmul.mubr.msk.bf16.vlgmr.msra.gmra.mrb[0].mxu1 %vm313_vm1, %v291_v33 }
 0x119   :  { %v869_v36 = vpop.eup %868  ;;  %819 = vmatpush3.bf16.msra.mxu1 %v460_v49 }
 0x11a   :  { %v279_v37 = vmul.f32 0.5, %v869_v36  ;;  %v286_v38 = vadd.f32 0.5, %v278_v35 }
 0x11c   :  { %v287_v39 = vadd.f32 0.5, %v279_v37 }
 0x11e   :  { %v292_v40 = vpack.c.bf16 %v287_v39, %v286_v38  ;;  %v855_v39 = vld [vmem:[%s1149_s7 + $0x4] ss:$8 sps:$4 sm:$0xff]  }
 0x11f   :  { %v871_v41 = vpop.eup %870  ;;  %611 = vmatprep.subr.bf16.mxu1 %v855_v39 }
 0x120   :  { %v280_v42 = vmul.f32 0.5, %v871_v41  ;;  %814 = vmatprep.mubr.msk.bf16.mxu1 %vm313_vm1, %v292_v40  ;;  %v853_v40 = vld [vmem:[%s1149_s7] ss:$8 sps:$4 sm:$0xff]   ;;  %v565_v41 = vld [vmem:[%s1149_s7 + $0x10] sm:$0x33] }
 0x121   :  { %v873_v43 = vpop.eup %872 }
 0x122   :  { %v281_v44 = vmul.f32 0.5, %v873_v43  ;;  %v288_v45 = vadd.f32 0.5, %v280_v42  ;;  %v749_v42 = vcombine.high %v565_v41, %v565_v41  ;;  %v748_v43 = vcombine.low %v565_v41, %v565_v41 }
 0x124   :  { %v289_v46 = vadd.f32 0.5, %v281_v44  ;;  %v606_v44 = vsel %vm326_vm0, %v748_v43, 0 }
 0x126   :  { %v293_v47 = vpack.c.bf16 %v289_v46, %v288_v45  ;;  %v930_v45 = vmov 0   ;;  %v740_v46 = vld [vmem:[%s1148_s6] ss:$0 sm:$0xff] }
 0x128   :  { %815 = vmatmul.mubr.msk.bf16.gmra.mrb[4].mxu1 %vm313_vm1, %v293_v47 }
 0x1eb   :  { %v812_v51 = vpop.f32.mrb[0].mxu1 }
 0x1ec   :  { %v373_v52 = vadd.f32 %v812_v51, %v733_v50  ;;  %v364_v53 = vpop.f32.mrb[1].mxu1 }
 0x1ed   :  { %v365_v54 = vadd.f32 %v733_v50, %v364_v53  ;;  %v813_v55 = vpop.f32.mrb[2].mxu1 }
 0x1ee   :  { %v397_v56 = vmul.f32 0.5, %v373_v52  ;;  %v376_v57 = vadd.f32 %v813_v55, %v733_v50  ;;  %v367_v58 = vpop.f32.mrb[3].mxu1 }
 0x1ef   :  { %v395_v59 = vmul.f32 0.5, %v365_v54  ;;  %v368_v60 = vadd.f32 %v733_v50, %v367_v58 }
 0x1f0   :  { %874 = vtanh.f32 %v397_v56  ;;  %v398_v61 = vmul.f32 0.5, %v376_v57 }
 0x1f1   :  { %876 = vtanh.f32 %v395_v59  ;;  %v396_v62 = vmul.f32 0.5, %v368_v60 }
 0x1f2   :  { %878 = vtanh.f32 %v398_v61 }
 0x1f3   :  { %880 = vtanh.f32 %v396_v62 }
 0x1fa   :  { %v875_v63 = vpop.eup %874 }
 0x1fb   :  { %v877_v0 = vpop.eup %876  ;;  %v413_v1 = vmul.f32 0.5, %v875_v63  ;;  %v816_v2 = vpop.f32.mrb[4].mxu1 }
 0x1fc   :  { %v879_v3 = vpop.eup %878  ;;  %v411_v4 = vmul.f32 0.5, %v877_v0  ;;  %v389_v5 = vadd.f32 %v816_v2, %v733_v50  ;;  %v380_v6 = vpop.f32.mrb[5].mxu1 }
 0x1fd   :  { %v881_v7 = vpop.eup %880  ;;  %v414_v8 = vmul.f32 0.5, %v879_v3  ;;  %v381_v9 = vadd.f32 %v733_v50, %v380_v6  ;;  %v817_v10 = vpop.f32.mrb[6].mxu1  ;;  %v421_v15 = vadd.f32 0.5, %v413_v1 }
 0x1fe   :  { %v412_v11 = vmul.f32 0.5, %v881_v7  ;;  %v401_v12 = vmul.f32 0.5, %v389_v5  ;;  %v392_v13 = vadd.f32 %v817_v10, %v733_v50  ;;  %v383_v14 = vpop.f32.mrb[7].mxu1  ;;  %v419_v19 = vadd.f32 0.5, %v411_v4 }
 0x1ff   :  { %v422_v16 = vadd.f32 0.5, %v414_v8  ;;  %v399_v17 = vmul.f32 0.5, %v381_v9  ;;  %v384_v18 = vadd.f32 %v733_v50, %v383_v14 }
 0x200   :  { %v420_v20 = vadd.f32 0.5, %v412_v11  ;;  %882 = vtanh.f32 %v401_v12  ;;  %v402_v21 = vmul.f32 0.5, %v392_v13 }
 0x201   :  { %v428_v22 = vpack.c.bf16 %v422_v16, %v421_v15  ;;  %884 = vtanh.f32 %v399_v17  ;;  %v400_v23 = vmul.f32 0.5, %v384_v18 }
 0x202   :  { %v427_v24 = vpack.c.bf16 %v420_v20, %v419_v19  ;;  %886 = vtanh.f32 %v402_v21 }
 0x203   :  { %888 = vtanh.f32 %v400_v23 }
 0x204   :  { %820 = vmatprep.mubr.msk.bf16.mxu1 %vm445_vm3, %v427_v24 }
 0x205   :  { %821 = vmatmul.mubr.msk.bf16.vlgmr.msra.gmra.mrb[8].mxu1 %vm445_vm3, %v428_v22 }
 0x206   :  { %612 = vmatpush1.bf16.msra.mxu1 %v853_v40 }
 0x207   :  { %750 = vmatprep.subr.msk.bf16.mxu1 %vm326_vm0, %v749_v42 }
 0x20a   :  { %v883_v25 = vpop.eup %882  ;;  %614 = vmatpush1.bf16.msra.mxu1 %v606_v44 }
 0x20b   :  { %v885_v26 = vpop.eup %884  ;;  %v417_v27 = vmul.f32 0.5, %v883_v25 }
 0x20c   :  { %v887_v28 = vpop.eup %886  ;;  %v415_v29 = vmul.f32 0.5, %v885_v26 }
 0x20d   :  { %v889_v30 = vpop.eup %888  ;;  %v418_v31 = vmul.f32 0.5, %v887_v28  ;;  %v425_v33 = vadd.f32 0.5, %v417_v27 }
 0x20e   :  { %v416_v32 = vmul.f32 0.5, %v889_v30  ;;  %v423_v35 = vadd.f32 0.5, %v415_v29 }
 0x20f   :  { %v426_v34 = vadd.f32 0.5, %v418_v31 }
 0x210   :  { %v424_v36 = vadd.f32 0.5, %v416_v32 }
 0x211   :  { %v430_v37 = vpack.c.bf16 %v426_v34, %v425_v33 }
 0x212   :  { %v429_v38 = vpack.c.bf16 %v424_v36, %v423_v35  ;;  %v568_v35 = vlaneseq }
 0x214   :  { %824 = vmatprep.mubr.msk.bf16.mxu1 %vm445_vm3, %v429_v38  ;;  %v569_v36 = vshrl.u32 %v568_v35, 7  ;;  %v566_v38 = vld [vmem:[%s1150_s8] sm:$0x3]  ;;  %s931_s8 = smov [#allocation2]  }
 0x215   :  { %825 = vmatmul.mubr.msk.bf16.gmra.mrb[12].mxu1 %vm445_vm3, %v430_v37  ;;  %s705_s21 = sshll.u32 %s931_s8, 4  ;;  %s706_s21 = int_to_ptr.vmem [resolvable:$true] %s705_s21 }
 0x216   :  { %643 = vmatprep.mubr.bf16.mxu1 %v930_v45  ;;  %v570_v37 = vsub.s32 0, %v569_v36  ;;  %v574_v39 = vsub.s32 1, %v569_v36  ;;  %s906_s22 = scalar_lea.vmem %s706_s21, 2048  ;;  %p911_p1 = scmp.lt.s32.totalorder %s706_s21, %s706_s21 }
 0x217   :  { %p907_p0 = scmp.ne.s32.totalorder %s706_s21, %s906_s22  ;;  %p912_p2 = scmp.lt.s32.totalorder %s906_s22, %s906_s22 }
 0x218   :  { %v571_v40 = vrot.slane %v566_v38, %v570_v37  ;;  %v575_v41 = vrot.slane %v566_v38, %v574_v39 }
 0x219   :  { %p913_p3 = por %p912_p2, %p911_p1 }
 0x21b   :  { %p914_p4 = pnand %p913_p3, %p907_p0 }
 0x2d8   :  { %v822_v47 = vpop.f32.mrb[8].mxu1 }
 0x2d9   :  { %v505_v48 = vadd.f32 %v822_v47, %v740_v46  ;;  %v496_v49 = vpop.f32.mrb[9].mxu1 }
 0x2da   :  { %v497_v50 = vadd.f32 %v740_v46, %v496_v49  ;;  %v823_v51 = vpop.f32.mrb[10].mxu1 }
 0x2db   :  { %v529_v52 = vmul.f32 0.5, %v505_v48  ;;  %v508_v53 = vadd.f32 %v823_v51, %v740_v46  ;;  %v499_v54 = vpop.f32.mrb[11].mxu1 }
 0x2dc   :  { %v527_v55 = vmul.f32 0.5, %v497_v50  ;;  %v500_v56 = vadd.f32 %v740_v46, %v499_v54 }
 0x2dd   :  { %890 = vtanh.f32 %v529_v52  ;;  %v530_v57 = vmul.f32 0.5, %v508_v53 }
 0x2de   :  { %892 = vtanh.f32 %v527_v55  ;;  %v528_v58 = vmul.f32 0.5, %v500_v56 }
 0x2df   :  { %894 = vtanh.f32 %v530_v57 }
 0x2e0   :  { %896 = vtanh.f32 %v528_v58 }
 0x2e7   :  { %v891_v59 = vpop.eup %890 }
 0x2e8   :  { %v893_v60 = vpop.eup %892  ;;  %v545_v61 = vmul.f32 0.5, %v891_v59  ;;  %v826_v62 = vpop.f32.mrb[12].mxu1 }
 0x2e9   :  { %v895_v63 = vpop.eup %894  ;;  %v543_v0 = vmul.f32 0.5, %v893_v60  ;;  %v521_v1 = vadd.f32 %v826_v62, %v740_v46  ;;  %v512_v2 = vpop.f32.mrb[13].mxu1 }
 0x2ea   :  { %v897_v3 = vpop.eup %896  ;;  %v546_v4 = vmul.f32 0.5, %v895_v63  ;;  %v513_v5 = vadd.f32 %v740_v46, %v512_v2  ;;  %v827_v6 = vpop.f32.mrb[14].mxu1  ;;  %v553_v11 = vadd.f32 0.5, %v545_v61 }
 0x2eb   :  { %v544_v7 = vmul.f32 0.5, %v897_v3  ;;  %v533_v8 = vmul.f32 0.5, %v521_v1  ;;  %v524_v9 = vadd.f32 %v827_v6, %v740_v46  ;;  %v515_v10 = vpop.f32.mrb[15].mxu1  ;;  %v551_v15 = vadd.f32 0.5, %v543_v0 }
 0x2ec   :  { %v554_v12 = vadd.f32 0.5, %v546_v4  ;;  %v531_v13 = vmul.f32 0.5, %v513_v5  ;;  %v516_v14 = vadd.f32 %v740_v46, %v515_v10 }
 0x2ed   :  { %v552_v16 = vadd.f32 0.5, %v544_v7  ;;  %898 = vtanh.f32 %v533_v8  ;;  %v534_v17 = vmul.f32 0.5, %v524_v9 }
 0x2ee   :  { %v560_v18 = vpack.c.bf16 %v554_v12, %v553_v11  ;;  %900 = vtanh.f32 %v531_v13  ;;  %v532_v19 = vmul.f32 0.5, %v516_v14 }
 0x2ef   :  { %v559_v20 = vpack.c.bf16 %v552_v16, %v551_v15  ;;  %902 = vtanh.f32 %v534_v17 }
 0x2f0   :  { %904 = vtanh.f32 %v532_v19 }
 0x2f1   :  { %751 = vmatmul.mubr.msk.bf16.vlgmr.msra.gmra.mrb[16].mxu1 %vm313_vm1, %v559_v20 }
 0x2f2   :  { %653 = vmatprep.mubr.bf16.mxu1 %v930_v45 }
 0x2f7   :  { %v899_v21 = vpop.eup %898 }
 0x2f8   :  { %v901_v22 = vpop.eup %900  ;;  %v549_v23 = vmul.f32 0.5, %v899_v21 }
 0x2f9   :  { %v903_v24 = vpop.eup %902  ;;  %v547_v25 = vmul.f32 0.5, %v901_v22  ;;  %752 = vmatmul.mubr.msk.bf16.gmra.mrb[20].mxu1 %vm313_vm1, %v560_v18 }
 0x2fa   :  { %v905_v26 = vpop.eup %904  ;;  %v550_v27 = vmul.f32 0.5, %v903_v24  ;;  %663 = vmatprep.mubr.bf16.mxu1 %v930_v45  ;;  %v557_v29 = vadd.f32 0.5, %v549_v23 }
 0x2fb   :  { %v548_v28 = vmul.f32 0.5, %v905_v26  ;;  %v555_v31 = vadd.f32 0.5, %v547_v25 }
 0x2fc   :  { %v558_v30 = vadd.f32 0.5, %v550_v27 }
 0x2fd   :  { %v556_v32 = vadd.f32 0.5, %v548_v28 }
 0x2fe   :  { %v562_v33 = vpack.c.bf16 %v558_v30, %v557_v29 }
 0x2ff   :  { %v561_v34 = vpack.c.bf16 %v556_v32, %v555_v31 }
 0x301   :  { %753 = vmatmul.mubr.msk.bf16.gmra.mrb[24].mxu1 %vm313_vm1, %v561_v34 }
 0x302   :  { %673 = vmatprep.mubr.bf16.mxu1 %v930_v45 }
 0x309   :  { %754 = vmatmul.mubr.msk.bf16.gmra.mrb[28].mxu1 %vm313_vm1, %v562_v33 }
 0x3c4   :  { %v645_v42 = vpop.f32.mrb[16].mxu1 }
 0x3c5   :  { %v646_v43 = vadd.f32 %v645_v42, %v571_v40  ;;  %v647_v44 = vpop.f32.mrb[17].mxu1 }
 0x3c6   :  { %v648_v46 = vadd.f32 %v647_v44, %v575_v41  ;;  %v649_v47 = vpop.f32.mrb[18].mxu1 }
 0x3c7   :  { %684 = vst [vmem:[#allocation2] sm:$0xff] %v646_v43  ;;  %v650_v48 = vadd.f32 %v649_v47, %v571_v40  ;;  %v651_v45 = vpop.f32.mrb[19].mxu1 }
 0x3c8   :  { %685 = vst [vmem:[#allocation2 + $0x8] sm:$0xff] %v648_v46  ;;  %v652_v49 = vadd.f32 %v651_v45, %v575_v41 }
 0x3c9   :  { %686 = vst [vmem:[#allocation2 + $0x10] sm:$0xff] %v650_v48 }
 0x3ca   :  { %687 = vst [vmem:[#allocation2 + $0x18] sm:$0xff] %v652_v49 }
 0x3cc   :  { %v655_v50 = vpop.f32.mrb[20].mxu1 }
 0x3cd   :  { %v656_v51 = vadd.f32 %v655_v50, %v571_v40  ;;  %v657_v52 = vpop.f32.mrb[21].mxu1 }
 0x3ce   :  { %v658_v53 = vadd.f32 %v657_v52, %v575_v41  ;;  %v659_v54 = vpop.f32.mrb[22].mxu1 }
 0x3cf   :  { %688 = vst [vmem:[#allocation2 + $0x20] sm:$0xff] %v656_v51  ;;  %v660_v55 = vadd.f32 %v659_v54, %v571_v40  ;;  %v661_v56 = vpop.f32.mrb[23].mxu1 }
 0x3d0   :  { %689 = vst [vmem:[#allocation2 + $0x28] sm:$0xff] %v658_v53  ;;  %v662_v57 = vadd.f32 %v661_v56, %v575_v41 }
 0x3d1   :  { %690 = vst [vmem:[#allocation2 + $0x30] sm:$0xff] %v660_v55 }
 0x3d2   :  { %691 = vst [vmem:[#allocation2 + $0x38] sm:$0xff] %v662_v57 }
 0x3d4   :  { %v665_v58 = vpop.f32.mrb[24].mxu1 }
 0x3d5   :  { %v666_v59 = vadd.f32 %v665_v58, %v571_v40  ;;  %v667_v60 = vpop.f32.mrb[25].mxu1 }
 0x3d6   :  { %v668_v61 = vadd.f32 %v667_v60, %v575_v41  ;;  %v669_v62 = vpop.f32.mrb[26].mxu1 }
 0x3d7   :  { %692 = vst [vmem:[#allocation2 + $0x40] sm:$0xff] %v666_v59  ;;  %v670_v63 = vadd.f32 %v669_v62, %v571_v40  ;;  %v671_v0 = vpop.f32.mrb[27].mxu1 }
 0x3d8   :  { %693 = vst [vmem:[#allocation2 + $0x48] sm:$0xff] %v668_v61  ;;  %v672_v1 = vadd.f32 %v671_v0, %v575_v41 }
 0x3d9   :  { %694 = vst [vmem:[#allocation2 + $0x50] sm:$0xff] %v670_v63 }
 0x3da   :  { %695 = vst [vmem:[#allocation2 + $0x58] sm:$0xff] %v672_v1 }
 0x3dc   :  { %v675_v2 = vpop.f32.mrb[28].mxu1 }
 0x3dd   :  { %v676_v3 = vadd.f32 %v675_v2, %v571_v40  ;;  %v677_v4 = vpop.f32.mrb[29].mxu1 }
 0x3de   :  { %v678_v5 = vadd.f32 %v677_v4, %v575_v41  ;;  %v679_v6 = vpop.f32.mrb[30].mxu1 }
 0x3df   :  { %696 = vst [vmem:[#allocation2 + $0x60] sm:$0xff] %v676_v3  ;;  %v680_v7 = vadd.f32 %v679_v6, %v571_v40  ;;  %v681_v8 = vpop.f32.mrb[31].mxu1 }
 0x3e0   :  { %697 = vst [vmem:[#allocation2 + $0x68] sm:$0xff] %v678_v5  ;;  %v682_v9 = vadd.f32 %v681_v8, %v575_v41 }
 0x3e1   :  { %698 = vst [vmem:[#allocation2 + $0x70] sm:$0xff] %v680_v7 }
 0x3e2   :  { %699 = vst [vmem:[#allocation2 + $0x78] sm:$0xff] %v682_v9 }
 0x3e3   :  { %917 = shalt.err (!%p914_p4)
}
 0x3e4   :  { %s918_s25 = scalar_lea.hbm %s1151_s9, 2048 }
 0x3e5   :  { %p919_p5 = scmp.ne.s32.totalorder %s1151_s9, %s918_s25  ;;  %p922_p6 = scmp.lt.u32.totalorder %s918_s25, %s1151_s9 }
 0x3e7   :  { %p924_p7 = pnand %p922_p6, %p919_p5 }
 0x3e9   :  { %927 = shalt.err (!%p924_p7)
}
 0x3ea   :  { %s932_s30 = smov 256   ;;  %s933_s10 = smov 16  }
 0x3eb   :  { %711 = dma.vmem_to_hbm [thread:$0]  %s706_s21, 2048, %s1151_s9, [#allocation3], %s932_s30, %s932_s30, %s933_s10  }
 0x3ec   :  { %928 = dma.done.wait [#allocation3], 2048  }
 0x3ed   :  { %929 = vsyncadd [#allocation3], 4294965248 }
 0x3ee   :  { %715 = vsyncpa [#allocation3], 1 }

</bundles_post_ra>
